<compile_context>
chip_gen: v6e
topology: v6e:2x2x1
jax: 0.10.0
libtpu: 0.0.40
codegen_flags: <defaults>
</compile_context>

<pallas_src>
import jax
import jax.numpy as jnp
from jax import lax
from jax.experimental import pallas as pl
from jax.experimental.pallas import tpu as pltpu

EPS = 1e-5
NEG_SLOPE = 0.2


# --------------------------------------------------------------------------- #
# Kernel 1: tiled matmul (conv as im2col) + one-pass instance-norm statistics #
# --------------------------------------------------------------------------- #
def _conv_stats_kernel(w_ref, x_ref, y_ref, psum_ref, psq_ref, sum_acc, sq_acc):
    # w_ref   : (C_out, tK)  bf16
    # x_ref   : (tK, tP)     bf16   (batch dim squeezed)
    # y_ref   : (C_out, tP)  f32    raw conv output tile (resident across K tiles)
    # psum_ref: (C_out, 1)   f32    per-sample sum over P
    # psq_ref : (C_out, 1)   f32    per-sample sum of squares over P
    # sum_acc, sq_acc: (C_out, 1) f32 VMEM scratch accumulators
    j = pl.program_id(1)          # P tile
    k = pl.program_id(2)          # K (reduction) tile
    nj = pl.num_programs(1)
    nk = pl.num_programs(2)

    @pl.when((j == 0) & (k == 0))
    def _():
        sum_acc[...] = jnp.zeros_like(sum_acc)
        sq_acc[...] = jnp.zeros_like(sq_acc)

    @pl.when(k == 0)
    def _():
        y_ref[...] = jnp.zeros_like(y_ref)

    # bf16 x bf16 -> f32 accumulate on the MXU, directly into the resident output.
    y_ref[...] += jnp.dot(w_ref[...], x_ref[...],
                          preferred_element_type=jnp.float32)

    @pl.when(k == nk - 1)
    def _():
        y = y_ref[...]
        sum_acc[...] += jnp.sum(y, axis=1, keepdims=True)
        sq_acc[...] += jnp.sum(y * y, axis=1, keepdims=True)

    @pl.when((j == nj - 1) & (k == nk - 1))
    def _():
        psum_ref[...] = sum_acc[...]
        psq_ref[...] = sq_acc[...]


# --------------------------------------------------------------------------- #
# Kernel 2: apply instance norm (precomputed scale/shift) + LeakyReLU(0.2)    #
# --------------------------------------------------------------------------- #
def _norm_lrelu_kernel(y_ref, scale_ref, shift_ref, o_ref):
    # y_ref: (C_out, tP) f32 ; scale/shift: (C_out, 1) f32 ; o_ref: (C_out, tP)
    y = y_ref[...] * scale_ref[...] + shift_ref[...]
    o_ref[...] = jnp.where(y >= 0, y, NEG_SLOPE * y).astype(o_ref.dtype)


# --------------------------------------------------------------------------- #
# Wrapper                                                                     #
# --------------------------------------------------------------------------- #
def _pick_tile(total, target, align):
    """Largest `align`-multiple divisor of `total` that is <= target (or full dim)."""
    if total <= target:
        return total
    t = (target // align) * align
    while t >= align:
        if total % t == 0:
            return t
        t -= align
    return total


def _im2col_kp(x_nchw):
    """NCHW -> (N, K, P) patches for a 4x4 / stride 2 / pad 1 conv.

    K = C_in*16 with index c*16 + kh*4 + kw (matches weight.reshape(C_out, C_in*16)),
    P = H_out*W_out.
    """
    n, c, h, w = x_nchw.shape
    ho, wo = h // 2, w // 2
    xp = jnp.pad(x_nchw, ((0, 0), (0, 0), (1, 1), (1, 1)))
    taps = []
    for kh in range(4):
        for kw in range(4):
            taps.append(xp[:, :, kh:kh + 2 * ho:2, kw:kw + 2 * wo:2])  # (N,C,Ho,Wo)
    pat = jnp.stack(taps, axis=2)                      # (N, C, 16, Ho, Wo)
    return pat.reshape(n, c * 16, ho * wo), ho, wo


def unet_down_nobp(x_nchw, weight):
    """x_nchw: (N, C_in, H, W), weight: (C_out, C_in, 4, 4). Returns NCHW f32 output."""
    n, c_in, h, w = x_nchw.shape
    c_out = weight.shape[0]
    ho, wo = h // 2, w // 2
    p = ho * wo
    k_dim = c_in * 16

    # bf16 MXU operands (f32 accumulation inside the kernel).
    patches, _, _ = _im2col_kp(x_nchw.astype(jnp.bfloat16))        # (N, K, P)
    w_mat = weight.reshape(c_out, k_dim).astype(jnp.bfloat16)      # (C_out, K)

    tp = _pick_tile(p, 512, 128)       # lane tile over spatial positions
    tk = _pick_tile(k_dim, 512, 128)   # reduction tile
    n_pt = p // tp
    n_kt = k_dim // tk

    y, psum, psq = pl.pallas_call(
        _conv_stats_kernel,
        out_shape=(
            jax.ShapeDtypeStruct((n, c_out, p), jnp.float32),
            jax.ShapeDtypeStruct((n, c_out, 1), jnp.float32),
            jax.ShapeDtypeStruct((n, c_out, 1), jnp.float32),
        ),
        grid_spec=pltpu.PrefetchScalarGridSpec(
            num_scalar_prefetch=0,
            grid=(n, n_pt, n_kt),
            in_specs=[
                pl.BlockSpec((c_out, tk), lambda i, j, k: (0, k)),
                pl.BlockSpec((pl.Squeezed(), tk, tp), lambda i, j, k: (i, k, j)),
            ],
            out_specs=[
                pl.BlockSpec((pl.Squeezed(), c_out, tp), lambda i, j, k: (i, 0, j)),
                pl.BlockSpec((pl.Squeezed(), c_out, 1), lambda i, j, k: (i, 0, 0)),
                pl.BlockSpec((pl.Squeezed(), c_out, 1), lambda i, j, k: (i, 0, 0)),
            ],
            scratch_shapes=[
                pltpu.VMEM((c_out, 1), jnp.float32),
                pltpu.VMEM((c_out, 1), jnp.float32),
            ],
        ),
        compiler_params=pltpu.CompilerParams(
            # P must be "arbitrary": the per-sample statistics accumulate across P tiles.
            dimension_semantics=("parallel", "arbitrary", "arbitrary")),
    )(w_mat, patches)

    # Tiny per-(sample, channel) finalization of the one-pass statistics (f32).
    mean = psum[:, :, 0] / p
    var = jnp.maximum(psq[:, :, 0] / p - mean * mean, 0.0)
    scale = lax.rsqrt(var + EPS)            # (N, C_out)
    shift = -mean * scale
    scale3 = scale[:, :, None]              # (N, C_out, 1)
    shift3 = shift[:, :, None]

    out = pl.pallas_call(
        _norm_lrelu_kernel,
        out_shape=jax.ShapeDtypeStruct((n, c_out, p), jnp.float32),
        grid_spec=pltpu.PrefetchScalarGridSpec(
            num_scalar_prefetch=0,
            grid=(n, n_pt),
            in_specs=[
                pl.BlockSpec((pl.Squeezed(), c_out, tp), lambda i, j: (i, 0, j)),
                pl.BlockSpec((pl.Squeezed(), c_out, 1), lambda i, j: (i, 0, 0)),
                pl.BlockSpec((pl.Squeezed(), c_out, 1), lambda i, j: (i, 0, 0)),
            ],
            out_specs=pl.BlockSpec((pl.Squeezed(), c_out, tp), lambda i, j: (i, 0, j)),
        ),
        compiler_params=pltpu.CompilerParams(
            dimension_semantics=("parallel", "parallel")),
    )(y, scale3, shift3)

    # (N, C_out, P) -> NCHW is a free reshape (no transpose).
    return out.reshape(n, c_out, ho, wo)


# --------------------------------------------------------------------------- #
# Reference + test                                                            #
# --------------------------------------------------------------------------- #
def _reference(x_nchw, weight):
    y = lax.conv_general_dilated(
        x_nchw.astype(jnp.float32), weight.astype(jnp.float32),
        window_strides=(2, 2), padding=((1, 1), (1, 1)),
        dimension_numbers=("NCHW", "OIHW", "NCHW"))
    mean = jnp.mean(y, axis=(2, 3), keepdims=True)
    var = jnp.mean((y - mean) ** 2, axis=(2, 3), keepdims=True)
    yn = (y - mean) * lax.rsqrt(var + EPS)
    return jnp.where(yn >= 0, yn, NEG_SLOPE * yn)


if __name__ == "__main__":
    key = jax.random.PRNGKey(0)
    kx, kw = jax.random.split(key)

    N, C_IN, C_OUT, H, W = 2, 4, 8, 16, 16
    x = jax.random.normal(kx, (N, C_IN, H, W), dtype=jnp.float32)
    fan_in = C_IN * 4 * 4
    weight = jax.random.normal(kw, (C_OUT, C_IN, 4, 4), dtype=jnp.float32) / jnp.sqrt(fan_in)

    out = unet_down_nobp(x, weight)
    jax.block_until_ready(out)
    assert out.shape == (N, C_OUT, H // 2, W // 2)

    # Tight check vs a bf16-input-matched f32 reference (isolates kernel correctness
    # from the intentional bf16 quantization of the matmul operands).
    x_q = x.astype(jnp.bfloat16).astype(jnp.float32)
    w_q = weight.astype(jnp.bfloat16).astype(jnp.float32)
    ref_q = _reference(x_q, w_q)
    assert jnp.allclose(out, ref_q, atol=2e-3, rtol=2e-3)

    # Loose sanity check vs the pure-f32 module semantics.
    ref = _reference(x, weight)
    assert jnp.allclose(out, ref, atol=5e-2, rtol=5e-2)

    print("KERNEL_OK")
</pallas_src>

<mosaic_0001>
module attributes {stable_mosaic.version = 11 : i64} {
  func.func @_conv_stats_kernel(%arg0: i32, %arg1: i32, %arg2: i32, %arg3: memref<8x64xbf16, #tpu.memory_space<vmem>>, %arg4: memref<1x64x64xbf16, #tpu.memory_space<vmem>>, %arg5: memref<1x8x64xf32, #tpu.memory_space<vmem>>, %arg6: memref<1x8x1xf32, #tpu.memory_space<vmem>>, %arg7: memref<1x8x1xf32, #tpu.memory_space<vmem>>, %arg8: memref<8x1xf32, #tpu.memory_space<vmem>>, %arg9: memref<8x1xf32, #tpu.memory_space<vmem>>) attributes {dimension_semantics = [#tpu.dimension_semantics<parallel>, #tpu.dimension_semantics<arbitrary>, #tpu.dimension_semantics<arbitrary>], iteration_bounds = array<i64: 2, 1, 1>, scalar_prefetch = 0 : i64, scratch_operands = 2 : i64, tpu.core_type = #tpu.core_type<tc>, window_params = [{transform_indices = @transform_0, window_bounds = array<i64: 8, 64>}, {transform_indices = @transform_1, window_bounds = array<i64: 1, 64, 64>}, {transform_indices = @transform_2, window_bounds = array<i64: 1, 8, 64>}, {transform_indices = @transform_3, window_bounds = array<i64: 1, 8, 1>}, {transform_indices = @transform_4, window_bounds = array<i64: 1, 8, 1>}]} {
    %c0_i32 = arith.constant 0 : i32
    %0 = arith.cmpi eq, %arg1, %c0_i32 : i32
    %c0_i32_0 = arith.constant 0 : i32
    %1 = arith.cmpi eq, %arg2, %c0_i32_0 : i32
    %2 = arith.andi %0, %1 : i1
    %3 = arith.extui %2 : i1 to i32
    %c0_i32_1 = arith.constant 0 : i32
    %4 = arith.cmpi ne, %3, %c0_i32_1 : i32
    scf.if %4 {
      %cst_19 = arith.constant 0.000000e+00 : f32
      %26 = vector.broadcast %cst_19 : f32 to vector<8x1xf32>
      %c0_20 = arith.constant 0 : index
      %c0_21 = arith.constant 0 : index
      %27 = vector.load %arg8[%c0_20, %c0_21] : memref<8x1xf32, #tpu.memory_space<vmem>>, vector<8x1xf32>
      tpu.vector_store %arg8[%c0_20, %c0_21], %26 {strides = array<i32>} : memref<8x1xf32, #tpu.memory_space<vmem>>, vector<8x1xf32>,
      %cst_22 = arith.constant 0.000000e+00 : f32
      %28 = vector.broadcast %cst_22 : f32 to vector<8x1xf32>
      %c0_23 = arith.constant 0 : index
      %c0_24 = arith.constant 0 : index
      %29 = vector.load %arg9[%c0_23, %c0_24] : memref<8x1xf32, #tpu.memory_space<vmem>>, vector<8x1xf32>
      tpu.vector_store %arg9[%c0_23, %c0_24], %28 {strides = array<i32>} : memref<8x1xf32, #tpu.memory_space<vmem>>, vector<8x1xf32>,
    } else {
    }
    %c0_i32_2 = arith.constant 0 : i32
    %5 = arith.cmpi eq, %arg2, %c0_i32_2 : i32
    %6 = arith.extui %5 : i1 to i32
    %c0_i32_3 = arith.constant 0 : i32
    %7 = arith.cmpi ne, %6, %c0_i32_3 : i32
    scf.if %7 {
      %cst_19 = arith.constant 0.000000e+00 : f32
      %26 = vector.broadcast %cst_19 : f32 to vector<8x64xf32>
      %c0_20 = arith.constant 0 : index
      %c0_21 = arith.constant 0 : index
      %c0_22 = arith.constant 0 : index
      %27 = vector.load %arg5[%c0_20, %c0_21, %c0_22] : memref<1x8x64xf32, #tpu.memory_space<vmem>>, vector<1x8x64xf32>
      %28 = vector.shape_cast %27 : vector<1x8x64xf32> to vector<8x64xf32>
      %29 = vector.shape_cast %26 : vector<8x64xf32> to vector<1x8x64xf32>
      tpu.vector_store %arg5[%c0_20, %c0_21, %c0_22], %29 {strides = array<i32>} : memref<1x8x64xf32, #tpu.memory_space<vmem>>, vector<1x8x64xf32>,
    } else {
    }
    %c0 = arith.constant 0 : index
    %c0_4 = arith.constant 0 : index
    %c0_5 = arith.constant 0 : index
    %8 = vector.load %arg5[%c0, %c0_4, %c0_5] : memref<1x8x64xf32, #tpu.memory_space<vmem>>, vector<1x8x64xf32>
    %9 = vector.shape_cast %8 : vector<1x8x64xf32> to vector<8x64xf32>
    %c0_6 = arith.constant 0 : index
    %c0_7 = arith.constant 0 : index
    %10 = vector.load %arg3[%c0_6, %c0_7] : memref<8x64xbf16, #tpu.memory_space<vmem>>, vector<8x64xbf16>
    %c0_8 = arith.constant 0 : index
    %c0_9 = arith.constant 0 : index
    %c0_10 = arith.constant 0 : index
    %11 = vector.load %arg4[%c0_8, %c0_9, %c0_10] : memref<1x64x64xbf16, #tpu.memory_space<vmem>>, vector<1x64x64xbf16>
    %12 = vector.shape_cast %11 : vector<1x64x64xbf16> to vector<64x64xbf16>
    %cst = arith.constant dense<0.000000e+00> : vector<8x64xf32>
    %13 = tpu.matmul %10, %12, %cst {dimension_numbers = #tpu.dot_dimension_numbers<[1], [0], [0], [1], [0, 0, 1, 1], [], []>} : vector<8x64xbf16>, vector<64x64xbf16>, vector<8x64xf32> -> vector<8x64xf32>
    %14 = arith.addf %9, %13 : vector<8x64xf32>
    %c0_11 = arith.constant 0 : index
    %c0_12 = arith.constant 0 : index
    %c0_13 = arith.constant 0 : index
    %15 = vector.load %arg5[%c0_11, %c0_12, %c0_13] : memref<1x8x64xf32, #tpu.memory_space<vmem>>, vector<1x8x64xf32>
    %16 = vector.shape_cast %15 : vector<1x8x64xf32> to vector<8x64xf32>
    %17 = vector.shape_cast %14 : vector<8x64xf32> to vector<1x8x64xf32>
    tpu.vector_store %arg5[%c0_11, %c0_12, %c0_13], %17 {strides = array<i32>} : memref<1x8x64xf32, #tpu.memory_space<vmem>>, vector<1x8x64xf32>,
    %c0_i32_14 = arith.constant 0 : i32
    %18 = arith.cmpi eq, %arg2, %c0_i32_14 : i32
    %19 = arith.extui %18 : i1 to i32
    %c0_i32_15 = arith.constant 0 : i32
    %20 = arith.cmpi ne, %19, %c0_i32_15 : i32
    scf.if %20 {
      %c0_19 = arith.constant 0 : index
      %c0_20 = arith.constant 0 : index
      %c0_21 = arith.constant 0 : index
      %26 = vector.load %arg5[%c0_19, %c0_20, %c0_21] : memref<1x8x64xf32, #tpu.memory_space<vmem>>, vector<1x8x64xf32>
      %27 = vector.shape_cast %26 : vector<1x8x64xf32> to vector<8x64xf32>
      %c0_22 = arith.constant 0 : index
      %c0_23 = arith.constant 0 : index
      %28 = vector.load %arg8[%c0_22, %c0_23] : memref<8x1xf32, #tpu.memory_space<vmem>>, vector<8x1xf32>
      %cst_24 = arith.constant dense<0.000000e+00> : vector<8xf32>
      %29 = vector.multi_reduction <add>, %27, %cst_24 [1] : vector<8x64xf32> to vector<8xf32>
      %30 = vector.shape_cast %29 : vector<8xf32> to vector<8x1xf32>
      %31 = arith.addf %28, %30 : vector<8x1xf32>
      %c0_25 = arith.constant 0 : index
      %c0_26 = arith.constant 0 : index
      %32 = vector.load %arg8[%c0_25, %c0_26] : memref<8x1xf32, #tpu.memory_space<vmem>>, vector<8x1xf32>
      tpu.vector_store %arg8[%c0_25, %c0_26], %31 {strides = array<i32>} : memref<8x1xf32, #tpu.memory_space<vmem>>, vector<8x1xf32>,
      %c0_27 = arith.constant 0 : index
      %c0_28 = arith.constant 0 : index
      %33 = vector.load %arg9[%c0_27, %c0_28] : memref<8x1xf32, #tpu.memory_space<vmem>>, vector<8x1xf32>
      %34 = arith.mulf %27, %27 : vector<8x64xf32>
      %cst_29 = arith.constant dense<0.000000e+00> : vector<8xf32>
      %35 = vector.multi_reduction <add>, %34, %cst_29 [1] : vector<8x64xf32> to vector<8xf32>
      %36 = vector.shape_cast %35 : vector<8xf32> to vector<8x1xf32>
      %37 = arith.addf %33, %36 : vector<8x1xf32>
      %c0_30 = arith.constant 0 : index
      %c0_31 = arith.constant 0 : index
      %38 = vector.load %arg9[%c0_30, %c0_31] : memref<8x1xf32, #tpu.memory_space<vmem>>, vector<8x1xf32>
      tpu.vector_store %arg9[%c0_30, %c0_31], %37 {strides = array<i32>} : memref<8x1xf32, #tpu.memory_space<vmem>>, vector<8x1xf32>,
    } else {
    }
    %c0_i32_16 = arith.constant 0 : i32
    %21 = arith.cmpi eq, %arg1, %c0_i32_16 : i32
    %c0_i32_17 = arith.constant 0 : i32
    %22 = arith.cmpi eq, %arg2, %c0_i32_17 : i32
    %23 = arith.andi %21, %22 : i1
    %24 = arith.extui %23 : i1 to i32
    %c0_i32_18 = arith.constant 0 : i32
    %25 = arith.cmpi ne, %24, %c0_i32_18 : i32
    scf.if %25 {
      %c0_19 = arith.constant 0 : index
      %c0_20 = arith.constant 0 : index
      %26 = vector.load %arg8[%c0_19, %c0_20] : memref<8x1xf32, #tpu.memory_space<vmem>>, vector<8x1xf32>
      %c0_21 = arith.constant 0 : index
      %c0_22 = arith.constant 0 : index
      %c0_23 = arith.constant 0 : index
      %27 = vector.load %arg6[%c0_21, %c0_22, %c0_23] : memref<1x8x1xf32, #tpu.memory_space<vmem>>, vector<1x8x1xf32>
      %28 = vector.shape_cast %27 : vector<1x8x1xf32> to vector<8x1xf32>
      %29 = vector.shape_cast %26 : vector<8x1xf32> to vector<1x8x1xf32>
      tpu.vector_store %arg6[%c0_21, %c0_22, %c0_23], %29 {strides = array<i32>} : memref<1x8x1xf32, #tpu.memory_space<vmem>>, vector<1x8x1xf32>,
      %c0_24 = arith.constant 0 : index
      %c0_25 = arith.constant 0 : index
      %30 = vector.load %arg9[%c0_24, %c0_25] : memref<8x1xf32, #tpu.memory_space<vmem>>, vector<8x1xf32>
      %c0_26 = arith.constant 0 : index
      %c0_27 = arith.constant 0 : index
      %c0_28 = arith.constant 0 : index
      %31 = vector.load %arg7[%c0_26, %c0_27, %c0_28] : memref<1x8x1xf32, #tpu.memory_space<vmem>>, vector<1x8x1xf32>
      %32 = vector.shape_cast %31 : vector<1x8x1xf32> to vector<8x1xf32>
      %33 = vector.shape_cast %30 : vector<8x1xf32> to vector<1x8x1xf32>
      tpu.vector_store %arg7[%c0_26, %c0_27, %c0_28], %33 {strides = array<i32>} : memref<1x8x1xf32, #tpu.memory_space<vmem>>, vector<1x8x1xf32>,
    } else {
    }
    return
  }
  func.func @transform_0(%arg0: i32, %arg1: i32, %arg2: i32) -> (i32, i32) {
    %c0_i32 = arith.constant 0 : i32
    %c0_i32_0 = arith.constant 0 : i32
    return %c0_i32, %arg2 : i32, i32
  }
  func.func @transform_1(%arg0: i32, %arg1: i32, %arg2: i32) -> (i32, i32, i32) {
    %c0_i32 = arith.constant 0 : i32
    return %arg0, %arg2, %arg1 : i32, i32, i32
  }
  func.func @transform_2(%arg0: i32, %arg1: i32, %arg2: i32) -> (i32, i32, i32) {
    %c0_i32 = arith.constant 0 : i32
    %c0_i32_0 = arith.constant 0 : i32
    return %arg0, %c0_i32, %arg1 : i32, i32, i32
  }
  func.func @transform_3(%arg0: i32, %arg1: i32, %arg2: i32) -> (i32, i32, i32) {
    %c0_i32 = arith.constant 0 : i32
    %c0_i32_0 = arith.constant 0 : i32
    %c0_i32_1 = arith.constant 0 : i32
    return %arg0, %c0_i32, %c0_i32_0 : i32, i32, i32
  }
  func.func @transform_4(%arg0: i32, %arg1: i32, %arg2: i32) -> (i32, i32, i32) {
    %c0_i32 = arith.constant 0 : i32
    %c0_i32_0 = arith.constant 0 : i32
    %c0_i32_1 = arith.constant 0 : i32
    return %arg0, %c0_i32, %c0_i32_0 : i32, i32, i32
  }
}

</mosaic_0001>

<bundles_post_ra>
// kernel: tpu_custom_call.1
= control target key start
LH: loop header
LB: loop body
LE: loop exit
PB: predicated region body
PF: predicated region fallthrough
CT: control target
= control target key end

     0   :  { %s1067_s0 = inlined_call_operand.hbm [shape: bf16[8,64], index: 0, kind: input, shape index: {}]   ;;  %s1068_s1 = inlined_call_operand.hbm [shape: bf16[2,64,64], index: 1, kind: input, shape index: {}]   ;;  %s1069_s2 = inlined_call_operand.hbm [shape: f32[2,8,64], index: 2, kind: output, shape index: {0}]   ;;  %s1070_s3 = inlined_call_operand.vmem [shape: f32[2,8,1], index: 3, kind: output, shape index: {1}]   ;;  %s1071_s4 = inlined_call_operand.vmem [shape: f32[2,8,1], index: 4, kind: output, shape index: {2}]  }
   0x1   :  { %1075 = sst [smem:[#allocation14_spill]] %s1067_s0 }
   0x2   :  { %10 = vsyncpa [#allocation5], 0 }
   0x3   :  { %11 = vsyncpa [#allocation8], 0 }
   0x4   :  { %13 = vsyncpa [#allocation8 + $0x1], 0 }
   0x5   :  { %14 = vsyncpa [#allocation6], 0 }
   0x6   :  { %16 = vsyncpa [#allocation6 + $0x1], 0  ;;  %s877_s15 = smov 0   ;;  %s879_s16 = smov 0  }
   0x7   :  { %s881_s17 = smov 0   ;;  %s883_s18 = smov 0  }
   0x8   :  { %s885_s19 = smov 0   ;;  %s887_s20 = smov 0  }
   0x9 LB: > { %s583_s21 = sadd.s32 4294967295, %s843_s20   ;;  %s584_s22 = sadd.s32 4294967294, %s843_s20   ;;  %s843_s20 = sphi %s887_s20, %s22_s20   ;;  %s839_s19 = sphi %s885_s19, %s1095_s19   ;;  %s835_s18 = sphi %s883_s18, %s1094_s18   ;;  %s831_s17 = sphi %s881_s17, %s1093_s17   ;;  %s827_s16 = sphi %s879_s16, %s1092_s16   ;;  %s823_s15 = sphi %s877_s15, %s1091_s15  }
   0xa   : > { %s78_s23 = sadd.s32 1, %s831_s17  ;;  %p85_p0 = scmp.ne.s32.totalorder %s831_s17, %s827_s16 }
   0xb   : > { %p86_p1 = scmp.eq.s32.totalorder %s843_s20, 0  ;;  %p91_p2 = scmp.ne.s32.totalorder %s827_s16, %s823_s15 }
   0xc   : > { %p915_p3 = scmp.eq.s32.totalorder %s583_s21, 0  ;;  %p117_p4 = scmp.eq.s32.totalorder %s583_s21, 1 }
   0xd   : > { %p919_p5 = por %p86_p1, %p85_p0  ;;  %p123_p6 = scmp.eq.s32.totalorder %s584_s22, 1 }
   0xe   : > { %p925_p7 = por %p915_p3, %p91_p2  ;;  %p929_p8 = por %p117_p4, %p85_p0 }
   0xf   : > { %p933_p9 = por %p123_p6, %p91_p2  ;;  %p585_p10 = scmp.ge.s32.totalorder %s843_s20, 1 }
  0x10   : > { %s1078_s26 = scalar_select %p925_p7, 1, 0 }
  0x11   : > { %s1079_s27 = scalar_select %p929_p8, 1, 0 }
  0x12   : > { %s1080_s28 = scalar_select %p933_p9, 1, 0 }
  0x13   : > { %p182_p11 = scmp.lt.s32.totalorder %s843_s20, 3  ;;  %s845_s30 = smov [#allocation4]  }
  0x14   : > { %s197_s5 = sshll.u32 %s845_s30, 4  ;;  %p645_p1 = scmp.lt.s32.totalorder %s843_s20, 2  ;;  %s198_s5 = int_to_ptr.vmem [resolvable:$true] %s197_s5 }
  0x15   : > { %p940_p13 = pnand %p585_p10, %p182_p11  ;;  %s41_s8 = sadd.s32 1, %s839_s19 }
  0x16   : > { %p949_p4 = pnand %p645_p1, %p919_p5  ;;  %p43_p6 = scmp.ge.s32.totalorder %s41_s8, 2 }
  0x17   : > { %p632_p0 = pneg %p940_p13  ;;  %s208_s9 = sand.u32 1, %s831_s17  }
  0x18   : > { %s716_s10 = scalar_lea.vmem %s198_s5, 64  ;;  %p724_p8 = scmp.lt.s32.totalorder %s198_s5, %s198_s5 }
  0x19   : > { %p955_p2 = pnand %p632_p0, %p915_p3  ;;  %p717_p11 = scmp.ne.s32.totalorder %s198_s5, %s716_s10 }
  0x1a   : > { %p725_p5 = scmp.lt.s32.totalorder %s716_s10, %s716_s10 }
  0x1b   : > { %p707_p10 = pneg %p955_p2 }
  0x1c   : > { %p726_p1 = por %p725_p5, %p724_p8 }
  0x1d   : > { %p719_p12 = pnand %p717_p11, %p707_p10 }
  0x1f   : > { %p720_p9 = pneg %p719_p12 }
  0x21   : > { %p727_p7 = pnand %p726_p1, %p720_p9 }
  0x23   : > { %730 = shalt.err (!%p727_p7)
}
  0x24   : > { %s1084_s0 = sld [smem:[#allocation14_spill]]  ;;  %s1097_s8 = smov (%p43_p6, %s41_s8), 0 }
  0x25   : > { %1085 = sst [smem:[#allocation13_spill]] %s1097_s8  ;;  %s588_s13 = sshll.u32 %s208_s9, 5 }
  0x26   : > { %s71_s14 = ssub.s32 %s839_s19, %s1097_s8  ;;  %s606_s21 = sshll.u32 %s839_s19, 9 }
  0x27   : > { %p76_p12 = scmp.eq.s32.totalorder %s71_s14, 0  ;;  %s221_s30 = scalar_lea.hbm %s1068_s1, %s606_s21 }
  0x28   : > { %s212_s7 = scalar_lea.vmem [#allocation7], %s588_s13  ;;  %s209_s12 = scalar_lea.sflag [#allocation8], %s208_s9 }
  0x29   : > { %s222_s10 = sshll.u32 %s212_s7, 4  ;;  %p733_p7 = pneg %p949_p4  ;;  %s223_s10 = int_to_ptr.vmem [resolvable:$true] %s222_s10 }
  0x2a   : > { %635 = dma.hbm_to_vmem [thread:$0]  (!%p955_p2), %s1084_s0, 64, %s198_s5, [#allocation5]  }
  0x2b   : > { %s979_s11 = scalar_select %p76_p12, %s831_s17, %s78_s23  }
  0x2c   : > { %s744_s5 = scalar_lea.vmem %s223_s10, 512  ;;  %s846_s0 = smov [#allocation7]  }
  0x2d   : > { %p745_p8 = scmp.ne.s32.totalorder %s223_s10, %s744_s5  ;;  %s749_s14 = sshll.u32 %s846_s0, 4  ;;  %s750_s14 = int_to_ptr.vmem [resolvable:$false] %s749_s14 }
  0x2e   : > { %s751_s8 = scalar_lea.vmem %s750_s14, 1024  ;;  %p752_p2 = scmp.lt.s32.totalorder %s223_s10, %s750_s14 }
  0x2f   : > { %p747_p9 = pnand %p745_p8, %p733_p7  ;;  %p753_p6 = scmp.lt.s32.totalorder %s751_s8, %s744_s5 }
  0x31   : > { %p748_p0 = pneg %p747_p9  ;;  %p754_p10 = por %p753_p6, %p752_p2 }
  0x33   : > { %p755_p11 = pnand %p754_p10, %p748_p0 }
  0x35   : > { %758 = shalt.err (!%p755_p11)
}
  0x36   : > { %s847_s13 = smov 64   ;;  %s848_s23 = smov 4  }
  0x37   : > { %639 = dma.hbm_to_vmem [thread:$0]  (!%p949_p4), %s221_s30, 512, %s223_s10, %s209_s12, %s847_s13, %s847_s13, %s848_s23  }
  0x38   : > { %234 = sbr.rel (%p940_p13) target bundleno = 440 (0x1b8), region = 28 }
  0x3d   : > { %810 = dma.done.wait (%p915_p3), [#allocation5], 64  }
  0x3e   : > { %812 = vsyncadd (%p915_p3), [#allocation5], 4294967232  ;;  %s992_s0 = sand.u32 1, %s827_s16   ;;  %p1086_p5 = scmp.ne.s32.totalorder %s1078_s26, 0 }
  0x3f   : > { %s593_s8 = sshll.u32 %s992_s0, 5  ;;  %s241_s9 = scalar_lea.sflag [#allocation8], %s992_s0 }
  0x40   : > { %s244_s21 = scalar_lea.vmem [#allocation7], %s593_s8 }
  0x41   : > { %814 = dma.done.wait (%p1086_p5), %s241_s9, 512  }
  0x42   : > { %816 = vsyncadd (%p1086_p5), %s241_s9, 4294966784  ;;  %s594_s29 = sshll.u32 %s992_s0, 3  ;;  %v849_v0 = vmov 0.0   ;;  %vm850_vm0 = vmmov 0   ;;  %vm299_vm1 = vcmask 523264   ;;  %v701_v1 = vld [vmem:[%s244_s21 + $0x18] sm:$0xff]  }
  0x43   : > { %612 = vmatprep.subr.bf16.mxu0 %v849_v0  ;;  %620 = vmatprep.mubr.msk.bf16.mxu0 %vm850_vm0, %v849_v0  ;;  %s1001_s24 = scalar_lea.vmem [#allocation9], %s594_s29  ;;  %v702_v2 = vld [vmem:[%s244_s21 + $0x10] sm:$0xff]   ;;  %v703_v3 = vld [vmem:[%s244_s21 + $0x8] sm:$0xff]   ;;  %v704_v4 = vld [vmem:[%s244_s21] sm:$0xff]   ;;  %vm293_vm2 = vcmask 7168   ;;  %s603_s26 = sshll.u32 %s835_s18, 7 }
  0x44   : > { %300 = vst.msk [vmem:[%s1001_s24] sm:$0xff] %vm299_vm1, %v849_v0  ;;  %613 = vmatpush3.bf16.msra.mxu0 %v701_v1  ;;  %v302_v5 = vld [vmem:[#allocation4] sm:$0xf]  ;;  %s429_s6 = sshll.u32 %s1001_s24, 4  ;;  %s427_s30 = scalar_lea.hbm %s1069_s2, %s603_s26  ;;  %s430_s6 = int_to_ptr.vmem [resolvable:$true] %s429_s6 }
  0x45   : > { %614 = vmatprep.subr.bf16.mxu0 %v849_v0  ;;  %294 = vst.msk [vmem:[#allocation2] sm:$0xff] %vm293_vm2, %v849_v0  ;;  %295 = vst.msk [vmem:[#allocation3] sm:$0xff] %vm293_vm2, %v849_v0  ;;  %s407_s7 = scalar_lea.sflag [#allocation6], %s992_s0  ;;  %s759_s10 = scalar_lea.vmem %s430_s6, 128 }
  0x46   : > { %p760_p3 = scmp.ne.s32.totalorder %s430_s6, %s759_s10  ;;  %p1087_p13 = scmp.ne.s32.totalorder %s1079_s27, 0 }
  0x47   : > { %s851_s12 = smov [#allocation9]  }
  0x48   : > { %615 = vmatpush3.bf16.msra.mxu0 %v702_v2  ;;  %p761_p4 = pnand %p760_p3, %p1087_p13  ;;  %s763_s5 = sshll.u32 %s851_s12, 4  ;;  %s764_s5 = int_to_ptr.vmem [resolvable:$false] %s763_s5 }
  0x49   : > { %616 = vmatprep.subr.bf16.mxu0 %v849_v0  ;;  %s765_s14 = scalar_lea.vmem %s764_s5, 256  ;;  %p766_p12 = scmp.lt.s32.totalorder %s430_s6, %s764_s5 }
  0x4a   : > { %p762_p1 = pneg %p761_p4  ;;  %p767_p7 = scmp.lt.s32.totalorder %s765_s14, %s759_s10 }
  0x4b   : > { %v301_v6 = vld [vmem:[%s1001_s24] sm:$0xff] }
  0x4c   : > { %617 = vmatpush3.bf16.msra.mxu0 %v703_v3  ;;  %p768_p8 = por %p767_p7, %p766_p12 }
  0x4d   : > { %618 = vmatprep.subr.bf16.mxu0 %v849_v0 }
  0x4e   : > { %p769_p9 = pnand %p768_p8, %p762_p1 }
  0x50   : > { %619 = vmatpush3.bf16.msra.mxu0 %v704_v4 }
  0x53   : > { %621 = vmatmul.mubr.msk.bf16.vlgmr.msra.gmra.mxu0 %vm299_vm1, %v302_v5 }
 0x113   : > { %v373_v7 = vpop.f32.mrf.mxu0 }
 0x114   : > { %v379_v8 = vadd.f32 %v373_v7, %v301_v6 }
 0x115   : > { %v622_v9 = vpop.f32.mrf.mxu0 }
 0x116   : > { %380 = vst.msk [vmem:[%s1001_s24] sm:$0xff] %vm299_vm1, %v379_v8 }
 0x117   : > { %v376_v10 = vpop.f32.mrf.mxu0 }
 0x119   : > { %v623_v11 = vpop.f32.mrf.mxu0 }
 0x11d   : > { %v384_v12 = vld [vmem:[%s1001_s24] sm:$0xff] }
 0x11e   : > { %v386_v13 = vsel %vm299_vm1, %v384_v12, 0.0  ;;  %v393_v14 = vmul.f32 %v384_v12, %v384_v12 }
 0x11f   : > { %387 = vadd.xlane.f32.xlu0 %v386_v13 }
 0x120   : > { %v394_v15 = vsel %vm299_vm1, %v393_v14, 0.0 }
 0x123   : > { %395 = vadd.xlane.f32.xlu0 %v394_v15 }
 0x124   : > { %772 = shalt.err (!%p769_p9)
}
 0x125   : > { %s773_s13 = scalar_lea.hbm %s427_s30, 128  ;;  %s777_s8 = scalar_lea.hbm %s1069_s2, 256 }
 0x126   : > { %p774_p0 = scmp.ne.s32.totalorder %s427_s30, %s773_s13  ;;  %p778_p10 = scmp.lt.s32.totalorder %s427_s30, %s1069_s2 }
 0x127   : > { %p779_p11 = scmp.lt.s32.totalorder %s777_s8, %s773_s13 }
 0x128   : > { %p775_p2 = pnand %p774_p0, %p1087_p13 }
 0x129   : > { %p780_p5 = por %p779_p11, %p778_p10 }
 0x12a   : > { %p776_p6 = pneg %p775_p2 }
 0x12c   : > { %p781_p3 = pnand %p780_p5, %p776_p6 }
 0x12e   : > { %784 = shalt.err (!%p781_p3)
}
 0x12f   : > { %630 = dma.vmem_to_hbm [thread:$0]  (%p1087_p13), %s430_s6, 128, %s427_s30, %s407_s7   ;;  %v385_v16 = vld [vmem:[#allocation2] sm:$0xff]  ;;  %v392_v19 = vld [vmem:[#allocation3] sm:$0xff] }
 0x130   : > { %p278_p4 = scmp.lt.s32.totalorder %s835_s18, 1 }
 0x132   : > { %s1099_s18 = smov (!%p278_p4, %s835_s18), 1 }
 0x133   : > { %s595_s29 = sshll.u32 %s1099_s18, 3 }
 0x134   : > { %s281_s27 = scalar_lea.vmem %s1070_s3, %s595_s29  ;;  %s285_s25 = scalar_lea.vmem %s1071_s4, %s595_s29 }
 0x1a8   : > { %v388_v17 = vpop.xlane.xlu0 %387 }
 0x1a9   : > { %v389_v18 = vadd.f32 %v388_v17, %v385_v16 }
 0x1ab   : > { %391 = vst.msk [vmem:[#allocation2] sm:$0xff] %vm293_vm2, %v389_v18 }
 0x1ac   : > { %v396_v20 = vpop.xlane.xlu0 %395 }
 0x1ad   : > { %v397_v21 = vadd.f32 %v396_v20, %v392_v19 }
 0x1af   : > { %398 = vst.msk [vmem:[#allocation3] sm:$0xff] %vm293_vm2, %v397_v21 }
 0x1b2   : > { %v401_v22 = vld [vmem:[#allocation2] sm:$0xff] }
 0x1b3   : > { %403 = vst.msk [vmem:[%s281_s27] sm:$0xff] %vm293_vm2, %v401_v22 }
 0x1b6   : > { %v404_v23 = vld [vmem:[#allocation3] sm:$0xff] }
 0x1b7   : > { %405 = vst.msk [vmem:[%s285_s25] sm:$0xff] %vm293_vm2, %v404_v23 }
 0x1b8 PF: > { %s447_s18 = sand.u32 1, %s823_s15   ;;  %p1088_p13 = scmp.ne.s32.totalorder %s1080_s28, 0 }
 0x1b9   : > { %p1089_p1 = scmp.ge.s32.totalorder %s843_s20, 2  ;;  %s448_s30 = scalar_lea.sflag [#allocation6], %s447_s18 }
 0x1bb   : > { %p641_p12 = pnand %p1089_p1, %p1088_p13 }
 0x1bd   : > { %p642_p7 = pneg %p641_p12 }
 0x1bf   : > { %818 = dma.done.wait (%p642_p7), %s448_s30, 128  }
 0x1c0   : > { %820 = vsyncadd (%p642_p7), %s448_s30, 4294967168  ;;  %s22_s20 = sadd.s32 1, %s843_s20   ;;  %s1090_s7 = sld [smem:[#allocation13_spill]] }
 0x1c1   : > { %p19_p8 = scmp.ge.s32.totalorder %s22_s20, 4   ;;  %s1091_s15 = smov %s827_s16 }
 0x1c2   : > { %s1092_s16 = smov %s831_s17  ;;  %s1093_s17 = smov %s979_s11 }
 0x1c3   : > { %s1094_s18 = smov %s839_s19  ;;  %21 = sbr.rel (!%p19_p8) target bundleno = 9 (0x9), region = 119 }
 0x1c6   : > { %s1095_s19 = smov %s1090_s7 }
 0x1c8   :  { %467 = vsyncpa [#allocation5], 1 }
 0x1c9   :  { %469 = vsyncpa [#allocation5 + $0x1], 1 }
 0x1ca   :  { %470 = vsyncpa [#allocation8], 1 }
 0x1cb   :  { %472 = vsyncpa [#allocation8 + $0x1], 1 }
 0x1cc   :  { %473 = vsyncpa [#allocation6], 1 }
 0x1cd   :  { %475 = vsyncpa [#allocation6 + $0x1], 1 }

</bundles_post_ra>
